<compile_context>
chip_gen: v7x
topology: tpu7x:2x2x1
jax: 0.10.0
libtpu: 0.0.40
codegen_flags: <defaults>
</compile_context>

<pallas_src>
import functools
import math

import jax
import jax.numpy as jnp
from jax.experimental import pallas as pl
from jax.experimental.pallas import tpu as pltpu

_C1 = math.sqrt(2.0 / math.pi)          # sqrt(2/pi)
_C2 = _C1 * 0.044715                    # folded: sqrt(2/pi) * 0.044715


def _gelu_f32(y):
    # tanh-approx GELU with folded constants; tanh goes to the EUP slot.
    inner = y * (_C1 + _C2 * (y * y))
    return 0.5 * (y + y * jnp.tanh(inner))


def _matmul_bias_kernel(x_ref, w_ref, b_ref, o_ref, *scratch, apply_gelu):
    """One (bm, bn) output tile; accumulate over the K grid axis (last, 'arbitrary').

    The accumulator is either a dedicated f32 VMEM scratch (narrow output
    dtypes, e.g. bf16 h) or the resident f32 output block itself (saves VMEM).
    """
    acc_ref = scratch[0] if scratch else o_ref
    k = pl.program_id(2)

    @pl.when(k == 0)
    def _():
        # Initialize with the broadcast bias: removes the bias add (and the
        # (1, bn) sublane broadcast) from the epilogue.
        acc_ref[...] = jnp.broadcast_to(
            b_ref[...].astype(jnp.float32), acc_ref.shape)

    # bf16 (or f32) operands, always f32 accumulation on the MXU.
    acc_ref[...] += jnp.dot(
        x_ref[...], w_ref[...], preferred_element_type=jnp.float32)

    if apply_gelu or scratch:
        @pl.when(k == pl.num_programs(2) - 1)
        def _():
            y = acc_ref[...]
            if apply_gelu:
                y = _gelu_f32(y)
            o_ref[...] = y.astype(o_ref.dtype)


@functools.lru_cache(maxsize=1)
def _select_tiles():
    """Per-generation tile targets + a cap on the scoped-VMEM limit we request."""
    try:
        kind = jax.devices()[0].device_kind.lower()
    except Exception:  # pragma: no cover - defensive
        kind = ""
    if "v7" in kind:
        # 64 MiB VMEM per TC: bm*bn/(bm+bn) ~ 341 FLOP/byte is already past the
        # v7x HBM/MXU crossover; keep the footprint small, two TCs share the grid.
        return {"tm": 512, "tn": 1024, "tk": 512, "vmem_cap": 56 << 20}
    if "v6" in kind:
        # 128 MiB VMEM: big tiles (bf16 in/out + f32 acc ~ 22 MiB) to reach the
        # 918 TF/s MXU roofline.
        return {"tm": 1024, "tn": 2048, "tk": 512, "vmem_cap": 100 << 20}
    if "v5" in kind and ("lite" in kind or "v5e" in kind):
        # v5e: modest bump (AI ~ 307) well under the 128 MiB physical VMEM.
        return {"tm": 512, "tn": 768, "tk": 512, "vmem_cap": 48 << 20}
    # Conservative default (v5p / unknown).
    return {"tm": 512, "tn": 1024, "tk": 512, "vmem_cap": 48 << 20}


def _block_and_pad(dim, target, align):
    """Return (block, padded_dim).  Never falls back to a huge full-dim block."""
    if dim <= target:
        return dim, dim                      # full extent: always legal
    block = max(align, (target // align) * align)
    padded = ((dim + block - 1) // block) * block
    return block, padded


def matmul_bias_act(x, w, b, *, apply_gelu, out_dtype=None):
    """y = act(x @ w + b) as one fused Pallas TPU kernel.

    x: (M, K), w: (K, N), b: (N,).  Operand dtypes are used as-is (cast to
    bf16 by the caller for MXU rate); accumulation is always f32.
    """
    M, K = x.shape
    K2, N = w.shape
    assert K == K2 and b.shape == (N,)
    out_dtype = jnp.dtype(out_dtype if out_dtype is not None else x.dtype)

    tiles = _select_tiles()
    bm, Mp = _block_and_pad(M, tiles["tm"], 8)
    bn, Np = _block_and_pad(N, tiles["tn"], 128)
    bk, Kp = _block_and_pad(K, tiles["tk"], 128)

    # Zero-pad ragged dims to a block multiple (cheap XLA pad, no kernel change).
    if (Mp, Kp) != (M, K):
        x = jnp.pad(x, ((0, Mp - M), (0, Kp - K)))
    if (Kp, Np) != (K, N):
        w = jnp.pad(w, ((0, Kp - K), (0, Np - N)))
    b2d = b.astype(jnp.float32).reshape(1, N)
    if Np != N:
        b2d = jnp.pad(b2d, ((0, 0), (0, Np - N)))

    grid = (Mp // bm, Np // bn, Kp // bk)

    # f32 outputs accumulate directly into the resident output block.
    use_scratch = out_dtype != jnp.dtype(jnp.float32)
    scratch_shapes = [pltpu.VMEM((bm, bn), jnp.float32)] if use_scratch else []

    # Size the scoped-VMEM request from the actual blocks (double-buffered ins
    # and outs + optional f32 acc), with headroom, capped per generation.
    vmem_est = (
        2 * bm * bk * x.dtype.itemsize
        + 2 * bk * bn * w.dtype.itemsize
        + 2 * 1 * bn * 4
        + 2 * bm * bn * out_dtype.itemsize
        + (bm * bn * 4 if use_scratch else 0)
    )
    vmem_limit = int(min(tiles["vmem_cap"], max(32 << 20, int(vmem_est * 1.3))))

    kernel = functools.partial(_matmul_bias_kernel, apply_gelu=apply_gelu)

    out = pl.pallas_call(
        kernel,
        out_shape=jax.ShapeDtypeStruct((Mp, Np), out_dtype),
        grid_spec=pltpu.PrefetchScalarGridSpec(
            num_scalar_prefetch=0,
            grid=grid,
            in_specs=[
                pl.BlockSpec((bm, bk), lambda i, j, k: (i, k)),
                pl.BlockSpec((bk, bn), lambda i, j, k: (k, j)),
                pl.BlockSpec((1, bn), lambda i, j, k: (0, j)),
            ],
            out_specs=pl.BlockSpec((bm, bn), lambda i, j, k: (i, j)),
            scratch_shapes=scratch_shapes,
        ),
        compiler_params=pltpu.CompilerParams(
            dimension_semantics=("parallel", "parallel", "arbitrary"),
            vmem_limit_bytes=vmem_limit,
        ),
    )(x, w, b2d)

    if (Mp, Np) != (M, N):
        out = out[:M, :N]
    return out


def feed_forward(x, w1, b1, w2, b2, *, use_bf16_operands=True):
    """FeedForward forward pass: Linear(D,4D) -> GELU(tanh) -> Linear(4D,D).

    x: (..., D); w1: (D, 4D), b1: (4D,), w2: (4D, D), b2: (D,).
    bf16 operands with f32 accumulation by default (MXU rate + half the HBM
    bytes); biases stay f32 and the final output keeps x's dtype.
    """
    orig_shape = x.shape
    out_dtype = x.dtype
    D = orig_shape[-1]
    x2d = x.reshape(-1, D)

    cdt = jnp.bfloat16 if use_bf16_operands else x2d.dtype
    xc = x2d.astype(cdt)
    w1c = w1.astype(cdt)
    w2c = w2.astype(cdt)
    # Intermediate h in bf16: halves its HBM write/read and feeds matmul 2 at
    # bf16 MXU rate (GELU computed in f32 before the cast).
    h_dtype = jnp.bfloat16 if use_bf16_operands else x2d.dtype

    h = matmul_bias_act(xc, w1c, b1, apply_gelu=True, out_dtype=h_dtype)
    y = matmul_bias_act(h, w2c, b2, apply_gelu=False, out_dtype=out_dtype)
    return y.reshape(orig_shape)


def feed_forward_ref(x, w1, b1, w2, b2):
    xf = x.astype(jnp.float32)
    h = xf @ w1.astype(jnp.float32) + b1.astype(jnp.float32)
    h = 0.5 * h * (1.0 + jnp.tanh(_C1 * (h + 0.044715 * h ** 3)))
    y = h @ w2.astype(jnp.float32) + b2.astype(jnp.float32)
    return y.astype(x.dtype)


if __name__ == "__main__":
    key = jax.random.PRNGKey(0)
    k_x, k_w1, k_b1, k_w2, k_b2 = jax.random.split(key, 5)

    batch, seq, emb_dim = 2, 8, 32
    hidden = 4 * emb_dim  # 128

    x = jax.random.normal(k_x, (batch, seq, emb_dim), dtype=jnp.float32)
    w1 = jax.random.normal(k_w1, (emb_dim, hidden), dtype=jnp.float32) * 0.1
    b1 = jax.random.normal(k_b1, (hidden,), dtype=jnp.float32) * 0.1
    w2 = jax.random.normal(k_w2, (hidden, emb_dim), dtype=jnp.float32) * 0.1
    b2 = jax.random.normal(k_b2, (emb_dim,), dtype=jnp.float32) * 0.1

    y = feed_forward(x, w1, b1, w2, b2)
    y = jax.block_until_ready(y)

    y_ref = feed_forward_ref(x, w1, b1, w2, b2)
    assert y.shape == x.shape and y.dtype == x.dtype
    # Tolerance loosened vs the pure-f32 path: bf16 MXU operands + bf16
    # intermediate h introduce ~1e-2-level error against the f32 reference.
    assert jnp.allclose(y, y_ref, atol=2e-2, rtol=2e-2), "mismatch vs reference"

    print("KERNEL_OK")
</pallas_src>

<mosaic_0001>
module attributes {stable_mosaic.version = 11 : i64} {
  func.func @_matmul_bias_kernel(%arg0: i32, %arg1: i32, %arg2: i32, %arg3: memref<16x32xbf16, #tpu.memory_space<vmem>>, %arg4: memref<32x128xbf16, #tpu.memory_space<vmem>>, %arg5: memref<1x128xf32, #tpu.memory_space<vmem>>, %arg6: memref<16x128xbf16, #tpu.memory_space<vmem>>, %arg7: memref<16x128xf32, #tpu.memory_space<vmem>>) attributes {dimension_semantics = [#tpu.dimension_semantics<parallel>, #tpu.dimension_semantics<parallel>, #tpu.dimension_semantics<arbitrary>], iteration_bounds = array<i64: 1, 1, 1>, scalar_prefetch = 0 : i64, scratch_operands = 1 : i64, tpu.core_type = #tpu.core_type<tc>, window_params = [{transform_indices = @transform_0, window_bounds = array<i64: 16, 32>}, {transform_indices = @transform_1, window_bounds = array<i64: 32, 128>}, {transform_indices = @transform_2, window_bounds = array<i64: 1, 128>}, {transform_indices = @transform_3, window_bounds = array<i64: 16, 128>}]} {
    %c0_i32 = arith.constant 0 : i32
    %0 = arith.cmpi eq, %arg2, %c0_i32 : i32
    %1 = arith.extui %0 : i1 to i32
    %c0_i32_0 = arith.constant 0 : i32
    %2 = arith.cmpi ne, %1, %c0_i32_0 : i32
    scf.if %2 {
      %c0_10 = arith.constant 0 : index
      %c0_11 = arith.constant 0 : index
      %12 = vector.load %arg5[%c0_10, %c0_11] : memref<1x128xf32, #tpu.memory_space<vmem>>, vector<1x128xf32>
      %13 = vector.shape_cast %12 : vector<1x128xf32> to vector<1x128xf32>
      %14 = vector.broadcast %13 : vector<1x128xf32> to vector<16x128xf32>
      %c0_12 = arith.constant 0 : index
      %c0_13 = arith.constant 0 : index
      %15 = vector.load %arg7[%c0_12, %c0_13] : memref<16x128xf32, #tpu.memory_space<vmem>>, vector<16x128xf32>
      tpu.vector_store %arg7[%c0_12, %c0_13], %14 {strides = array<i32>} : memref<16x128xf32, #tpu.memory_space<vmem>>, vector<16x128xf32>,
    } else {
    }
    %c0 = arith.constant 0 : index
    %c0_1 = arith.constant 0 : index
    %3 = vector.load %arg7[%c0, %c0_1] : memref<16x128xf32, #tpu.memory_space<vmem>>, vector<16x128xf32>
    %c0_2 = arith.constant 0 : index
    %c0_3 = arith.constant 0 : index
    %4 = vector.load %arg3[%c0_2, %c0_3] : memref<16x32xbf16, #tpu.memory_space<vmem>>, vector<16x32xbf16>
    %c0_4 = arith.constant 0 : index
    %c0_5 = arith.constant 0 : index
    %5 = vector.load %arg4[%c0_4, %c0_5] : memref<32x128xbf16, #tpu.memory_space<vmem>>, vector<32x128xbf16>
    %cst = arith.constant dense<0.000000e+00> : vector<16x128xf32>
    %6 = tpu.matmul %4, %5, %cst {dimension_numbers = #tpu.dot_dimension_numbers<[1], [0], [0], [1], [0, 0, 1, 1], [], []>} : vector<16x32xbf16>, vector<32x128xbf16>, vector<16x128xf32> -> vector<16x128xf32>
    %7 = arith.addf %3, %6 : vector<16x128xf32>
    %c0_6 = arith.constant 0 : index
    %c0_7 = arith.constant 0 : index
    %8 = vector.load %arg7[%c0_6, %c0_7] : memref<16x128xf32, #tpu.memory_space<vmem>>, vector<16x128xf32>
    tpu.vector_store %arg7[%c0_6, %c0_7], %7 {strides = array<i32>} : memref<16x128xf32, #tpu.memory_space<vmem>>, vector<16x128xf32>,
    %c0_i32_8 = arith.constant 0 : i32
    %9 = arith.cmpi eq, %arg2, %c0_i32_8 : i32
    %10 = arith.extui %9 : i1 to i32
    %c0_i32_9 = arith.constant 0 : i32
    %11 = arith.cmpi ne, %10, %c0_i32_9 : i32
    scf.if %11 {
      %c0_10 = arith.constant 0 : index
      %c0_11 = arith.constant 0 : index
      %12 = vector.load %arg7[%c0_10, %c0_11] : memref<16x128xf32, #tpu.memory_space<vmem>>, vector<16x128xf32>
      %13 = arith.mulf %12, %12 : vector<16x128xf32>
      %cst_12 = arith.constant 0.0356774069 : f32
      %14 = vector.broadcast %cst_12 : f32 to vector<16x128xf32>
      %15 = arith.mulf %14, %13 : vector<16x128xf32>
      %cst_13 = arith.constant 0.797884583 : f32
      %16 = vector.broadcast %cst_13 : f32 to vector<16x128xf32>
      %17 = arith.addf %16, %15 : vector<16x128xf32>
      %18 = arith.mulf %12, %17 : vector<16x128xf32>
      %19 = math.tanh %18 : vector<16x128xf32>
      %20 = arith.mulf %12, %19 : vector<16x128xf32>
      %21 = arith.addf %12, %20 : vector<16x128xf32>
      %cst_14 = arith.constant 5.000000e-01 : f32
      %22 = vector.broadcast %cst_14 : f32 to vector<16x128xf32>
      %23 = arith.mulf %22, %21 : vector<16x128xf32>
      %24 = arith.truncf %23 : vector<16x128xf32> to vector<16x128xbf16>
      %c0_15 = arith.constant 0 : index
      %c0_16 = arith.constant 0 : index
      %25 = vector.load %arg6[%c0_15, %c0_16] : memref<16x128xbf16, #tpu.memory_space<vmem>>, vector<16x128xbf16>
      tpu.vector_store %arg6[%c0_15, %c0_16], %24 {strides = array<i32>} : memref<16x128xbf16, #tpu.memory_space<vmem>>, vector<16x128xbf16>,
    } else {
    }
    return
  }
  func.func @transform_0(%arg0: i32, %arg1: i32, %arg2: i32) -> (i32, i32) {
    %c0_i32 = arith.constant 0 : i32
    return %arg0, %arg2 : i32, i32
  }
  func.func @transform_1(%arg0: i32, %arg1: i32, %arg2: i32) -> (i32, i32) {
    %c0_i32 = arith.constant 0 : i32
    return %arg2, %arg1 : i32, i32
  }
  func.func @transform_2(%arg0: i32, %arg1: i32, %arg2: i32) -> (i32, i32) {
    %c0_i32 = arith.constant 0 : i32
    %c0_i32_0 = arith.constant 0 : i32
    return %c0_i32, %arg1 : i32, i32
  }
  func.func @transform_3(%arg0: i32, %arg1: i32, %arg2: i32) -> (i32, i32) {
    %c0_i32 = arith.constant 0 : i32
    return %arg0, %arg1 : i32, i32
  }
}

</mosaic_0001>

<bundles_post_ra>
// kernel: tpu_custom_call.1
= control target key start
LH: loop header
LB: loop body
LE: loop exit
PB: predicated region body
PF: predicated region fallthrough
CT: control target
= control target key end

     0   :  { %8 = vsyncpa [#allocation4], 0  ;;  %s366_s0 = inlined_call_operand.hbm [shape: bf16[16,32], index: 0, kind: input, shape index: {}]   ;;  %s367_s1 = inlined_call_operand.hbm [shape: bf16[32,128], index: 1, kind: input, shape index: {}]   ;;  %s368_s2 = inlined_call_operand.vmem [shape: f32[1,128], index: 2, kind: input, shape index: {}]   ;;  %s369_s3 = inlined_call_operand.hbm [shape: bf16[16,128], index: 3, kind: output, shape index: {}]  }
   0x1   :  { %9 = vsyncpa [#allocation7], 0 }
   0x2   :  { %10 = vsyncpa [#allocation5], 0  ;;  %s291_s12 = smov [#allocation3]   ;;  %s219_s16 = scalar_lea.hbm %s366_s0, 128 }
   0x3   :  { %s16_s13 = sshll.u32 %s291_s12, 4  ;;  %p220_p0 = scmp.ne.s32.totalorder %s366_s0, %s219_s16  ;;  %s17_s13 = int_to_ptr.vmem [resolvable:$true] %s16_s13 }
   0x4   :  { %p223_p1 = scmp.lt.u32.totalorder %s219_s16, %s366_s0 }
   0x6   :  { %p225_p2 = pnand %p223_p1, %p220_p0 }
   0x8   :  { %228 = shalt.err (!%p225_p2)
}
   0x9   :  { %s229_s21 = scalar_lea.vmem %s17_s13, 128  ;;  %p234_p4 = scmp.lt.s32.totalorder %s17_s13, %s17_s13 }
   0xa   :  { %p230_p3 = scmp.ne.s32.totalorder %s17_s13, %s229_s21  ;;  %p235_p5 = scmp.lt.s32.totalorder %s229_s21, %s229_s21 }
   0xc   :  { %p236_p6 = por %p235_p5, %p234_p4 }
   0xe   :  { %p237_p7 = pnand %p236_p6, %p230_p3 }
  0x10   :  { %240 = shalt.err (!%p237_p7)
}
  0x11   :  { %s292_s22 = smov 64   ;;  %s293_s23 = smov 4  }
  0x12   :  { %22 = dma.hbm_to_vmem [thread:$0]  %s366_s0, 128, %s17_s13, [#allocation4], %s292_s22, %s292_s22, %s293_s23  }
  0x13   :  { %s294_s26 = smov [#allocation6]   ;;  %s241_s30 = scalar_lea.hbm %s367_s1, 256 }
  0x14   :  { %s28_s27 = sshll.u32 %s294_s26, 4  ;;  %p242_p8 = scmp.ne.s32.totalorder %s367_s1, %s241_s30  ;;  %s29_s27 = int_to_ptr.vmem [resolvable:$true] %s28_s27 }
  0x15   :  { %p245_p9 = scmp.lt.u32.totalorder %s241_s30, %s367_s1 }
  0x17   :  { %p247_p10 = pnand %p245_p9, %p242_p8 }
  0x19   :  { %250 = shalt.err (!%p247_p10)
}
  0x1a   :  { %s251_s8 = scalar_lea.vmem %s29_s27, 256  ;;  %p256_p12 = scmp.lt.s32.totalorder %s29_s27, %s29_s27 }
  0x1b   :  { %p252_p11 = scmp.ne.s32.totalorder %s29_s27, %s251_s8  ;;  %p257_p13 = scmp.lt.s32.totalorder %s251_s8, %s251_s8 }
  0x1d   :  { %p258_p0 = por %p257_p13, %p256_p12 }
  0x1f   :  { %p259_p1 = pnand %p258_p0, %p252_p11 }
  0x21   :  { %262 = shalt.err (!%p259_p1)
}
  0x22   :  { %34 = dma.hbm_to_vmem [thread:$0]  %s367_s1, 256, %s29_s27, [#allocation7], %s292_s22, %s292_s22, %s293_s23  }
  0x23   :  { %285 = dma.done.wait [#allocation4], 128  }
  0x24   :  { %286 = vsyncadd [#allocation4], 4294967168 }
  0x25   :  { %287 = dma.done.wait [#allocation7], 256  }
  0x26   :  { %288 = vsyncadd [#allocation7], 4294967040  ;;  %v295_v0 = vmov 0.0   ;;  %vm296_vm0 = vmmov 0   ;;  %v212_v1 = vld [vmem:[#allocation6] sm:$0xff]   ;;  %v213_v2 = vld [vmem:[#allocation6 + $0x8] sm:$0xff]  }
  0x27   :  { %197 = vmatprep.subr.bf16.mxu0 %v295_v0  ;;  %201 = vmatprep.mubr.msk.bf16.mxu0 %vm296_vm0, %v295_v0  ;;  %v214_v3 = vld [vmem:[#allocation3] sm:$0xff]   ;;  %vm82_vm1 = vcmask 261120   ;;  %s297_s1 = smov [#allocation8]  }
  0x28   :  { %198 = vmatpush3.bf16.msra.mxu0 %v212_v1  ;;  %v180_v4 = vld [vmem:[%s368_s2] ss:$0 sm:$0xff]  ;;  %s167_s2 = sshll.u32 %s297_s1, 4  ;;  %s168_s2 = int_to_ptr.vmem [resolvable:$true] %s167_s2 }
  0x29   :  { %199 = vmatprep.subr.bf16.mxu0 %v295_v0  ;;  %s263_s12 = scalar_lea.vmem %s168_s2, 128  ;;  %p268_p3 = scmp.lt.s32.totalorder %s168_s2, %s168_s2 }
  0x2a   :  { %p264_p2 = scmp.ne.s32.totalorder %s168_s2, %s263_s12  ;;  %p269_p4 = scmp.lt.s32.totalorder %s263_s12, %s263_s12 }
  0x2c   :  { %200 = vmatpush3.bf16.msra.mxu0 %v213_v2  ;;  %p270_p5 = por %p269_p4, %p268_p3 }
  0x2e   :  { %p271_p6 = pnand %p270_p5, %p264_p2 }
  0x2f   :  { %202 = vmatmul.mubr.msk.bf16.vlgmr.msra.gmra.mrb[0].mxu0 %vm82_vm1, %v214_v3 }
 0x102   :  { %v120_v5 = vpop.f32.mrb[0].mxu0 }
 0x103   :  { %v127_v6 = vadd.f32 %v180_v4, %v120_v5  ;;  %v203_v7 = vpop.f32.mrb[1].mxu0 }
 0x104   :  { %v123_v8 = vpop.f32.mrb[2].mxu0 }
 0x105   :  { %v136_v9 = vmul.f32 %v127_v6, %v127_v6  ;;  %v128_v10 = vadd.f32 %v180_v4, %v123_v8  ;;  %v204_v11 = vpop.f32.mrb[3].mxu0 }
 0x107   :  { %v138_v12 = vmul.f32 0.035677407, %v136_v9  ;;  %v137_v13 = vmul.f32 %v128_v10, %v128_v10 }
 0x109   :  { %v140_v14 = vadd.f32 0.7978846, %v138_v12  ;;  %v139_v15 = vmul.f32 0.035677407, %v137_v13 }
 0x10b   :  { %v142_v16 = vmul.f32 %v140_v14, %v127_v6  ;;  %v141_v17 = vadd.f32 0.7978846, %v139_v15 }
 0x10d   :  { %215 = vtanh.f32 %v142_v16  ;;  %v143_v18 = vmul.f32 %v141_v17, %v128_v10 }
 0x10f   :  { %217 = vtanh.f32 %v143_v18 }
 0x117   :  { %v216_v19 = vpop.eup %215 }
 0x118   :  { %v146_v20 = vmul.f32 %v216_v19, %v127_v6 }
 0x119   :  { %v218_v21 = vpop.eup %217 }
 0x11a   :  { %v147_v22 = vmul.f32 %v218_v21, %v128_v10  ;;  %v148_v23 = vadd.f32 %v146_v20, %v127_v6 }
 0x11c   :  { %v149_v24 = vadd.f32 %v147_v22, %v128_v10  ;;  %v150_v25 = vmul.f32 0.5, %v148_v23 }
 0x11e   :  { %v151_v26 = vmul.f32 0.5, %v149_v24 }
 0x120   :  { %v192_v27 = vpack.c.bf16 %v151_v26, %v150_v25 }
 0x122   :  { %193 = vst [vmem:[#allocation8] sm:$0xff] %v192_v27  }
 0x123   :  { %274 = shalt.err (!%p271_p6)
}
 0x124   :  { %s275_s15 = scalar_lea.hbm %s369_s3, 128 }
 0x125   :  { %p276_p7 = scmp.ne.s32.totalorder %s369_s3, %s275_s15  ;;  %p279_p8 = scmp.lt.u32.totalorder %s275_s15, %s369_s3 }
 0x127   :  { %p281_p9 = pnand %p279_p8, %p276_p7 }
 0x129   :  { %284 = shalt.err (!%p281_p9)
}
 0x12a   :  { %173 = dma.vmem_to_hbm [thread:$0]  %s168_s2, 128, %s369_s3, [#allocation5], %s292_s22, %s292_s22, %s293_s23  }
 0x12b   :  { %289 = dma.done.wait [#allocation5], 128  }
 0x12c   :  { %290 = vsyncadd [#allocation5], 4294967168 }
 0x12d   :  { %177 = vsyncpa [#allocation4], 1 }
 0x12e   :  { %178 = vsyncpa [#allocation7], 1 }
 0x12f   :  { %179 = vsyncpa [#allocation5], 1 }

</bundles_post_ra>
